<compile_context>
chip_gen: v5e
topology: v5e:2x2
jax: 0.10.0
libtpu: 0.0.40
codegen_flags: <defaults>
</compile_context>

<pallas_src>
import functools

import jax
import jax.numpy as jnp
from jax.experimental import pallas as pl
from jax.experimental.pallas import tpu as pltpu


def _conv_bn_relu_mp_kernel(cols_ref, w_ref, s_ref, o_ref, *, pool):
    """Fused (im2col-conv) + folded-BN shift + ReLU + MaxPool1d.

    cols_ref: (BB, TL*pool, KC_p)   im2col rows, lane-dense contraction dim
    w_ref:    (KC_p, C_out_p)       BN-folded weights, zero-padded
    s_ref:    (1, C_out_p)          folded shift = beta + (bias - mean) * scale
    o_ref:    (BB, TL, C_out_p)     pooled output block
    """
    BB, LPb, KC = cols_ref.shape
    TL = o_ref.shape[1]
    C = o_ref.shape[2]

    # One lane-dense MXU matmul covering the whole (batch, L) block.
    cols = cols_ref[...].reshape(BB * LPb, KC)
    acc = jnp.dot(cols, w_ref[...], preferred_element_type=jnp.float32)

    # Folded BN + conv bias, then ReLU (f32 epilogue).
    y = jnp.maximum(acc + s_ref[...], 0.0)              # (BB*LPb, C_out_p)

    # MaxPool1d(pool), stride=pool, floor semantics (tail dropped in wrapper).
    y = y.reshape(BB * TL, pool, C)
    o_ref[...] = jnp.max(y, axis=1).reshape(BB, TL, C).astype(o_ref.dtype)


def _pick_l_tile(L_out):
    """Output-row tile: full L_out when small, else a multiple-of-8 divisor."""
    if L_out <= 512:
        return L_out
    for tl in range(512, 7, -8):
        if L_out % tl == 0:
            return tl
    return L_out


def _pick_batch_block(N, per_batch_bytes, grid_l, target_bytes=1 << 20):
    """Largest divisor of N whose block stays ~target_bytes, keeping >=2 steps."""
    divisors = [d for d in range(1, N + 1) if N % d == 0]
    fitting = [d for d in divisors if d * per_batch_bytes <= target_bytes] or [1]
    # Keep at least 2 grid steps when possible so v7x's two TCs both get work.
    pref = [d for d in fitting if (N // d) * grid_l >= 2]
    return max(pref) if pref else max(fitting)


def conv_1d_forward(x, weight, bias, gamma, beta, running_mean, running_var,
                    *, stride=1, pool=2, eps=1e-5):
    """x: (N, C_in, L) in PyTorch NCL layout. Returns (N, C_out, (L_conv)//pool)."""
    assert stride == 1, "module default stride=1 is what we implement"
    N, C_in, L = x.shape
    C_out, C_in_w, K = weight.shape
    assert C_in_w == C_in
    pad = K // 2
    L_conv = L + 2 * pad - K + 1
    L_out = L_conv // pool
    L_pool = L_out * pool

    # --- fold BatchNorm (eval mode) + conv bias into weights / shift --------
    scale = gamma / jnp.sqrt(running_var + eps)                  # (C_out,)
    w_f = weight * scale[:, None, None]                          # (C_out, C_in, K)
    shift = beta + (bias - running_mean) * scale                 # (C_out,)
    # im2col weight layout: row index = k*C_in + c_in
    w2 = jnp.transpose(w_f, (2, 1, 0)).reshape(K * C_in, C_out)

    # --- lane-dense padding: contraction dim and output channels -> x128 ----
    KC = K * C_in
    KC_p = ((KC + 127) // 128) * 128
    C_out_p = ((C_out + 127) // 128) * 128
    w2 = jnp.pad(w2, ((0, KC_p - KC), (0, C_out_p - C_out)))
    w2 = w2.astype(x.dtype)             # bf16 inputs -> bf16-in / f32-acc MXU
    shift2 = jnp.pad(shift, (0, C_out_p - C_out)).reshape(1, C_out_p)
    shift2 = shift2.astype(jnp.float32)

    # --- wrapper-side im2col: (N, L_pool, KC_p), lane-dense last dim ---------
    x_cl = jnp.transpose(x, (0, 2, 1))                            # (N, L, C_in)
    x_pad = jnp.pad(x_cl, ((0, 0), (pad, pad), (0, 0)))           # (N, L+2p, C_in)
    cols = jnp.concatenate([x_pad[:, k:k + L_conv, :] for k in range(K)],
                           axis=-1)                               # (N, L_conv, KC)
    cols = cols[:, :L_pool, :]                                    # drop pool tail
    cols = jnp.pad(cols, ((0, 0), (0, 0), (0, KC_p - KC)))        # (N, L_pool, KC_p)

    # --- tiling --------------------------------------------------------------
    TL = _pick_l_tile(L_out)
    grid_l = L_out // TL
    itemsize = jnp.dtype(x.dtype).itemsize
    per_batch_bytes = (TL * pool * KC_p + TL * C_out_p) * itemsize
    bb = _pick_batch_block(N, per_batch_bytes, grid_l)
    grid_n = N // bb

    in_blk = bb * TL * pool * KC_p * itemsize
    out_blk = bb * TL * C_out_p * itemsize
    w_bytes = KC_p * C_out_p * itemsize + C_out_p * 4
    f32_tmp = bb * TL * pool * C_out_p * 4
    # double-buffered in/out + weights + f32 intermediates + margin, capped so
    # the same tiling is safe within v7x's smaller (64 MiB physical) VMEM.
    vmem_limit = int(min(3 * (in_blk + out_blk) + 2 * w_bytes + 4 * f32_tmp
                         + (4 << 20), 32 << 20))

    kernel = functools.partial(_conv_bn_relu_mp_kernel, pool=pool)

    out_cl = pl.pallas_call(
        kernel,
        out_shape=jax.ShapeDtypeStruct((N, L_out, C_out_p), x.dtype),
        grid_spec=pltpu.PrefetchScalarGridSpec(
            num_scalar_prefetch=0,
            grid=(grid_n, grid_l),
            in_specs=[
                pl.BlockSpec((bb, TL * pool, KC_p), lambda n, l: (n, l, 0)),
                pl.BlockSpec((KC_p, C_out_p), lambda n, l: (0, 0)),
                pl.BlockSpec((1, C_out_p), lambda n, l: (0, 0)),
            ],
            out_specs=pl.BlockSpec((bb, TL, C_out_p), lambda n, l: (n, l, 0)),
        ),
        compiler_params=pltpu.CompilerParams(
            dimension_semantics=("parallel", "parallel"),
            vmem_limit_bytes=vmem_limit,
        ),
    )(cols, w2, shift2)

    if C_out_p != C_out:
        out_cl = out_cl[..., :C_out]
    return jnp.transpose(out_cl, (0, 2, 1))                       # (N, C_out, L_out)


def _reference(x, weight, bias, gamma, beta, mean, var, *, pool=2, eps=1e-5):
    """Plain-JAX reference mirroring the PyTorch module (eval-mode BN)."""
    y = jax.lax.conv_general_dilated(
        x, weight, window_strides=(1,),
        padding=((weight.shape[-1] // 2,) * 2,),
        dimension_numbers=("NCH", "OIH", "NCH"))
    y = y + bias[None, :, None]
    y = (y - mean[None, :, None]) / jnp.sqrt(var[None, :, None] + eps)
    y = y * gamma[None, :, None] + beta[None, :, None]
    y = jnp.maximum(y, 0.0)
    N, C, L = y.shape
    Lp = (L // pool) * pool
    return y[:, :, :Lp].reshape(N, C, Lp // pool, pool).max(axis=-1)


if __name__ == "__main__":
    # Small shapes consistent with the module: Conv1d(C_in=4, C_out=8, k=3),
    # BatchNorm1d(8), MaxPool1d(2); input (N=2, C_in=4, L=16).
    N, C_in, C_out, L, K, POOL = 2, 4, 8, 16, 3, 2

    key = jax.random.PRNGKey(0)
    kx, kw, kb, kg, kbe, km, kv = jax.random.split(key, 7)
    x = jax.random.normal(kx, (N, C_in, L), dtype=jnp.float32)
    weight = jax.random.normal(kw, (C_out, C_in, K), dtype=jnp.float32) * 0.1
    bias = jax.random.normal(kb, (C_out,), dtype=jnp.float32) * 0.1
    gamma = 1.0 + 0.1 * jax.random.normal(kg, (C_out,), dtype=jnp.float32)
    beta = 0.1 * jax.random.normal(kbe, (C_out,), dtype=jnp.float32)
    running_mean = 0.1 * jax.random.normal(km, (C_out,), dtype=jnp.float32)
    running_var = jax.random.uniform(kv, (C_out,), minval=0.5, maxval=1.5,
                                     dtype=jnp.float32)

    out = conv_1d_forward(x, weight, bias, gamma, beta,
                          running_mean, running_var, pool=POOL)
    out = jax.block_until_ready(out)

    ref = _reference(x, weight, bias, gamma, beta,
                     running_mean, running_var, pool=POOL)
    assert out.shape == (N, C_out, L // POOL), out.shape
    assert jnp.allclose(out, ref, atol=3e-5, rtol=1e-4), "mismatch vs reference"

    print("KERNEL_OK")
</pallas_src>

<mosaic_0001>
module attributes {stable_mosaic.version = 11 : i64} {
  func.func @_conv_bn_relu_mp_kernel(%arg0: i32, %arg1: i32, %arg2: memref<1x16x128xf32, #tpu.memory_space<vmem>>, %arg3: memref<128x128xf32, #tpu.memory_space<vmem>>, %arg4: memref<1x128xf32, #tpu.memory_space<vmem>>, %arg5: memref<1x8x128xf32, #tpu.memory_space<vmem>>) attributes {dimension_semantics = [#tpu.dimension_semantics<parallel>, #tpu.dimension_semantics<parallel>], iteration_bounds = array<i64: 2, 1>, scalar_prefetch = 0 : i64, scratch_operands = 0 : i64, tpu.core_type = #tpu.core_type<tc>, window_params = [{transform_indices = @transform_0, window_bounds = array<i64: 1, 16, 128>}, {pipeline_mode = #tpu.pipeline_mode<synchronous>, transform_indices = @transform_1, window_bounds = array<i64: 128, 128>}, {pipeline_mode = #tpu.pipeline_mode<synchronous>, transform_indices = @transform_2, window_bounds = array<i64: 1, 128>}, {transform_indices = @transform_3, window_bounds = array<i64: 1, 8, 128>}]} {
    %c0 = arith.constant 0 : index
    %c0_0 = arith.constant 0 : index
    %c0_1 = arith.constant 0 : index
    %0 = vector.load %arg2[%c0, %c0_0, %c0_1] : memref<1x16x128xf32, #tpu.memory_space<vmem>>, vector<1x16x128xf32>
    %1 = vector.shape_cast %0 : vector<1x16x128xf32> to vector<16x128xf32>
    %c0_2 = arith.constant 0 : index
    %c0_3 = arith.constant 0 : index
    %2 = vector.load %arg3[%c0_2, %c0_3] : memref<128x128xf32, #tpu.memory_space<vmem>>, vector<128x128xf32>
    %cst = arith.constant dense<0.000000e+00> : vector<16x128xf32>
    %3 = tpu.matmul %1, %2, %cst {dimension_numbers = #tpu.dot_dimension_numbers<[1], [0], [0], [1], [0, 0, 1, 1], [], []>} : vector<16x128xf32>, vector<128x128xf32>, vector<16x128xf32> -> vector<16x128xf32>
    %c0_4 = arith.constant 0 : index
    %c0_5 = arith.constant 0 : index
    %4 = vector.load %arg4[%c0_4, %c0_5] : memref<1x128xf32, #tpu.memory_space<vmem>>, vector<1x128xf32>
    %5 = vector.broadcast %4 : vector<1x128xf32> to vector<16x128xf32>
    %6 = arith.addf %3, %5 : vector<16x128xf32>
    %cst_6 = arith.constant 0.000000e+00 : f32
    %7 = vector.broadcast %cst_6 : f32 to vector<16x128xf32>
    %8 = arith.maximumf %6, %7 : vector<16x128xf32>
    %9 = vector.shape_cast %8 : vector<16x128xf32> to vector<8x2x128xf32>
    %cst_7 = arith.constant dense<0xFF800000> : vector<8x128xf32>
    %10 = vector.multi_reduction <maximumf>, %9, %cst_7 [1] : vector<8x2x128xf32> to vector<8x128xf32>
    %11 = vector.shape_cast %10 : vector<8x128xf32> to vector<1x8x128xf32>
    %c0_8 = arith.constant 0 : index
    %c0_9 = arith.constant 0 : index
    %c0_10 = arith.constant 0 : index
    %12 = vector.load %arg5[%c0_8, %c0_9, %c0_10] : memref<1x8x128xf32, #tpu.memory_space<vmem>>, vector<1x8x128xf32>
    tpu.vector_store %arg5[%c0_8, %c0_9, %c0_10], %11 {strides = array<i32>} : memref<1x8x128xf32, #tpu.memory_space<vmem>>, vector<1x8x128xf32>,
    return
  }
  func.func @transform_0(%arg0: i32, %arg1: i32) -> (i32, i32, i32) {
    %c0_i32 = arith.constant 0 : i32
    %c0_i32_0 = arith.constant 0 : i32
    return %arg0, %arg1, %c0_i32 : i32, i32, i32
  }
  func.func @transform_1(%arg0: i32, %arg1: i32) -> (i32, i32) {
    %c0_i32 = arith.constant 0 : i32
    %c0_i32_0 = arith.constant 0 : i32
    %c0_i32_1 = arith.constant 0 : i32
    return %c0_i32, %c0_i32_0 : i32, i32
  }
  func.func @transform_2(%arg0: i32, %arg1: i32) -> (i32, i32) {
    %c0_i32 = arith.constant 0 : i32
    %c0_i32_0 = arith.constant 0 : i32
    %c0_i32_1 = arith.constant 0 : i32
    return %c0_i32, %c0_i32_0 : i32, i32
  }
  func.func @transform_3(%arg0: i32, %arg1: i32) -> (i32, i32, i32) {
    %c0_i32 = arith.constant 0 : i32
    %c0_i32_0 = arith.constant 0 : i32
    return %arg0, %arg1, %c0_i32 : i32, i32, i32
  }
}

</mosaic_0001>

<bundles_post_ra>
// kernel: tpu_custom_call.1
= control target key start
LH: loop header
LB: loop body
LE: loop exit
PB: predicated region body
PF: predicated region fallthrough
CT: control target
= control target key end

     0   :  { %s930_s0 = inlined_call_operand.hbm [shape: f32[2,16,128], index: 0, kind: input, shape index: {}]   ;;  %s931_s1 = inlined_call_operand.hbm [shape: f32[128,128], index: 1, kind: input, shape index: {}]   ;;  %s932_s2 = inlined_call_operand.vmem [shape: f32[1,128], index: 2, kind: input, shape index: {}]   ;;  %s933_s3 = inlined_call_operand.hbm [shape: f32[2,8,128], index: 3, kind: output, shape index: {}]  }
   0x1   :  { %935 = sst [smem:[#allocation11_spill]] %s931_s1 }
   0x2   :  { %8 = vsyncpa [#allocation3], 0 }
   0x3   :  { %10 = vsyncpa [#allocation3 + $0x1], 0 }
   0x4   :  { %11 = vsyncpa [#allocation6], 0 }
   0x5   :  { %12 = vsyncpa [#allocation4], 0 }
   0x6   :  { %14 = vsyncpa [#allocation4 + $0x1], 0  ;;  %s758_s12 = smov 0   ;;  %s760_s13 = smov 0  }
   0x7   :  { %s762_s14 = smov 0   ;;  %s764_s15 = smov 0  }
   0x8   :  { %s766_s16 = smov 0   ;;  %s768_s17 = smov 0  }
   0x9 LB: > { %s478_s18 = sadd.s32 4294967295, %s733_s17   ;;  %s479_s19 = sadd.s32 4294967294, %s733_s17   ;;  %s733_s17 = sphi %s768_s17, %s20_s17   ;;  %s729_s16 = sphi %s766_s16, %s949_s16   ;;  %s725_s15 = sphi %s764_s15, %s948_s15   ;;  %s721_s14 = sphi %s762_s14, %s947_s14   ;;  %s717_s13 = sphi %s760_s13, %s946_s13   ;;  %s713_s12 = sphi %s758_s12, %s945_s12  }
   0xa   : > { %p54_p0 = scmp.ne.s32.totalorder %s717_s13, %s713_s12  ;;  %p792_p1 = scmp.eq.s32.totalorder %s478_s18, 0 }
   0xb   : > { %p796_p2 = scmp.eq.s32.totalorder %s478_s18, 1  ;;  %p128_p3 = scmp.eq.s32.totalorder %s479_s19, 1 }
   0xc   : > { %p802_p4 = por %p792_p1, %p54_p0  ;;  %p480_p5 = scmp.ge.s32.totalorder %s733_s17, 1 }
   0xd   : > { %p807_p6 = por %p128_p3, %p54_p0  ;;  %p135_p7 = scmp.lt.s32.totalorder %s733_s17, 3 }
   0xe   : > { %s940_s1 = sld [smem:[#allocation11_spill]]  ;;  %s735_s28 = smov [#allocation5]  }
   0xf   : > { %p815_p8 = pnand %p480_p5, %p135_p7  ;;  %s148_s29 = sshll.u32 %s735_s28, 4  ;;  %s149_s29 = int_to_ptr.vmem [resolvable:$true] %s148_s29 }
  0x10   : > { %p482_p11 = scmp.ge.s32.totalorder %s733_s17, 2  ;;  %s934_s30 = smov 128  }
  0x11   : > { %p519_p9 = pneg %p815_p8  ;;  %s737_s4 = smov 8  }
  0x12   : > { %s32_s5 = sadd.s32 1, %s729_s16  ;;  %s41_s6 = sadd.s32 1, %s721_s14 }
  0x13   : > { %p520_p10 = pnand %p519_p9, %p792_p1  ;;  %p34_p12 = scmp.ge.s32.totalorder %s32_s5, 2 }
  0x14   : > { %s146_s26 = sshll.u32 %s940_s1, 4  ;;  %p48_p13 = scmp.ne.s32.totalorder %s721_s14, %s717_s13  ;;  %s147_s26 = int_to_ptr.hbm [resolvable:$true] %s146_s26 }
  0x15   : > { %522 = dma.hbm_to_vmem [thread:$0]  (!%p520_p10), %s147_s26, 2048, %s149_s29, [#allocation6], %s934_s30, %s934_s30, %s737_s4  }
  0x16   : > { %p49_p0 = scmp.eq.s32.totalorder %s733_s17, 0  ;;  %s951_s5 = smov (%p34_p12, %s32_s5), 0 }
  0x17   : > { %p840_p5 = por %p796_p2, %p48_p13  ;;  %s36_s9 = ssub.s32 %s729_s16, %s951_s5 }
  0x18   : > { %p834_p3 = por %p49_p0, %p48_p13  ;;  %p532_p7 = scmp.lt.s32.totalorder %s733_s17, 2 }
  0x19   : > { %p39_p9 = scmp.eq.s32.totalorder %s36_s9, 0  ;;  %s165_s10 = sand.u32 1, %s721_s14  }
  0x1a   : > { %s483_s11 = sshll.u32 %s165_s10, 4  ;;  %s494_s19 = sshll.u32 %s729_s16, 4 }
  0x1b   : > { %s849_s18 = scalar_select %p39_p9, %s721_s14, %s41_s6  }
  0x1c   : > { %s176_s26 = scalar_lea.hbm %s930_s0, %s494_s19  ;;  %s169_s28 = scalar_lea.vmem [#allocation2], %s483_s11 }
  0x1d   : > { %s179_s29 = sshll.u32 %s169_s28, 4  ;;  %s177_s21 = sshll.u32 %s176_s26, 4  ;;  %s180_s29 = int_to_ptr.vmem [resolvable:$true] %s179_s29  ;;  %s178_s21 = int_to_ptr.hbm [resolvable:$true] %s177_s21 }
  0x1e   : > { %p524_p2 = pnand %p532_p7, %p834_p3  ;;  %s166_s30 = scalar_lea.sflag [#allocation3], %s165_s10 }
  0x1f   : > { %s944_s1 = smov 128   ;;  %191 = sbr.rel (%p815_p8) target bundleno = 226 (0xe2), region = 32 }
  0x20   : > { %526 = dma.hbm_to_vmem [thread:$0]  (!%p524_p2), %s178_s21, 256, %s180_s29, %s166_s30, %s944_s1, %s944_s1, %s737_s4  }
  0x21   : > { %s863_s6 = sand.u32 (!%p815_p8), 1, %s717_s13  }
  0x22   : > { %s487_s9 = sshll.u32 (!%p815_p8), %s863_s6, 4  ;;  %s194_s11 = scalar_lea.sflag (!%p815_p8), [#allocation3], %s863_s6 }
  0x23   : > { %s867_s19 = scalar_lea.vmem (!%p815_p8), [#allocation2], %s487_s9 }
  0x24   : > { %700 = dma.done.wait (%p802_p4), %s194_s11, 256  }
  0x25   : > { %702 = vsyncadd (%p802_p4), %s194_s11, 4294967040 }
  0x26   : > { %704 = dma.done.wait (%p792_p1), [#allocation6], 2048  }
  0x27   : > { %706 = vsyncadd (%p792_p1), [#allocation6], 4294965248  ;;  %v244_v0 = vld [vmem:[#allocation5 + $0x78] sm:$0xff]  ;;  %v243_v1 = vld [vmem:[#allocation5 + $0x70] sm:$0xff]  ;;  %vm288_vm0 = vcmask 1041408   ;;  %vm353_vm1 = vcmask 1041409  }
  0x28   : > { %249 = vmatpush.msra.mxu0 %v244_v0  ;;  %495 = vmatpush.msra.mxu1 %v244_v0  ;;  %v242_v2 = vld [vmem:[#allocation5 + $0x68] sm:$0xff]  ;;  %v241_v3 = vld [vmem:[#allocation5 + $0x60] sm:$0xff]  ;;  %v240_v4 = vld [vmem:[#allocation5 + $0x58] sm:$0xff]  ;;  %s489_s22 = sshll.u32 %s863_s6, 3  ;;  %s491_s27 = sshll.u32 %s725_s15, 3  ;;  %vm355_vm2 = vcmask 1042434  }
  0x29   : > { %v239_v5 = vld [vmem:[#allocation5 + $0x50] sm:$0xff]  ;;  %v238_v6 = vld [vmem:[#allocation5 + $0x48] sm:$0xff]  ;;  %v237_v7 = vld [vmem:[#allocation5 + $0x40] sm:$0xff]  ;;  %vm357_vm3 = vcmask 1043459   ;;  %s381_s7 = scalar_lea.hbm %s933_s3, %s491_s27  ;;  %vm359_vm4 = vcmask 1044484   ;;  %vm361_vm5 = vcmask 1045509  }
  0x2a   : > { %250 = vmatpush.msra.mxu0 %v243_v1  ;;  %496 = vmatpush.msra.mxu1 %v243_v1  ;;  %v236_v8 = vld [vmem:[#allocation5 + $0x38] sm:$0xff]  ;;  %v235_v9 = vld [vmem:[#allocation5 + $0x30] sm:$0xff]  ;;  %v234_v10 = vld [vmem:[#allocation5 + $0x28] sm:$0xff]  ;;  %vm363_vm6 = vcmask 1046534   ;;  %s225_s15 = scalar_lea.vmem [#allocation7], %s489_s22  ;;  %s385_s24 = sshll.u32 %s381_s7, 4  ;;  %s386_s24 = int_to_ptr.hbm [resolvable:$true] %s385_s24 }
  0x2b   : > { %v233_v11 = vld [vmem:[#allocation5 + $0x20] sm:$0xff]  ;;  %v232_v12 = vld [vmem:[#allocation5 + $0x18] sm:$0xff]  ;;  %v231_v13 = vld [vmem:[#allocation5 + $0x10] sm:$0xff]  ;;  %s383_s10 = sshll.u32 %s225_s15, 4  ;;  %vm365_vm7 = vcmask 1047559   ;;  %s370_s25 = scalar_lea.sflag [#allocation4], %s863_s6  ;;  %s384_s10 = int_to_ptr.vmem [resolvable:$true] %s383_s10 }
  0x2c   : > { %251 = vmatpush.msra.mxu0 %v242_v2  ;;  %497 = vmatpush.msra.mxu1 %v242_v2  ;;  %v230_v14 = vld [vmem:[#allocation5 + $0x8] sm:$0xff]  ;;  %v229_v15 = vld [vmem:[#allocation5] sm:$0xff]  ;;  %s661_s26 = sshra.s32 %s386_s24, 4  ;;  %s667_s9 = scalar_lea.hbm %s933_s3, 16  ;;  %s662_s26 = int_to_ptr.hbm [resolvable:$true] %s661_s26 }
  0x2d   : > { %v227_v16 = vld [vmem:[%s867_s19] sm:$0xff]  ;;  %v228_v17 = vld [vmem:[%s867_s19 + $0x8] sm:$0xff]  ;;  %s663_s28 = scalar_lea.hbm %s662_s26, 8  ;;  %p668_p10 = scmp.lt.s32.totalorder %s662_s26, %s933_s3 }
  0x2e   : > { %252 = vmatpush.msra.mxu0 %v241_v3  ;;  %498 = vmatpush.msra.mxu1 %v241_v3  ;;  %v586_v18 = vld [vmem:[%s932_s2] ss:$0 sm:$0xff]  ;;  %p664_p1 = scmp.ne.s32.totalorder %s662_s26, %s663_s28  ;;  %p669_p12 = scmp.lt.s32.totalorder %s667_s9, %s663_s28 }
  0x30   : > { %253 = vmatpush.msra.mxu0 %v240_v4  ;;  %499 = vmatpush.msra.mxu1 %v240_v4  ;;  %p665_p4 = pnand %p664_p1, %p840_p5  ;;  %p670_p13 = por %p669_p12, %p668_p10 }
  0x32   : > { %254 = vmatpush.msra.mxu0 %v239_v5  ;;  %500 = vmatpush.msra.mxu1 %v239_v5  ;;  %p666_p8 = pneg %p665_p4 }
  0x34   : > { %255 = vmatpush.msra.mxu0 %v238_v6  ;;  %501 = vmatpush.msra.mxu1 %v238_v6  ;;  %p671_p0 = pnand %p670_p13, %p666_p8 }
  0x36   : > { %256 = vmatpush.msra.mxu0 %v237_v7  ;;  %502 = vmatpush.msra.mxu1 %v237_v7 }
  0x38   : > { %257 = vmatpush.msra.mxu0 %v236_v8  ;;  %503 = vmatpush.msra.mxu1 %v236_v8 }
  0x3a   : > { %258 = vmatpush.msra.mxu0 %v235_v9  ;;  %504 = vmatpush.msra.mxu1 %v235_v9 }
  0x3c   : > { %259 = vmatpush.msra.mxu0 %v234_v10  ;;  %505 = vmatpush.msra.mxu1 %v234_v10 }
  0x3e   : > { %260 = vmatpush.msra.mxu0 %v233_v11  ;;  %506 = vmatpush.msra.mxu1 %v233_v11 }
  0x40   : > { %261 = vmatpush.msra.mxu0 %v232_v12  ;;  %507 = vmatpush.msra.mxu1 %v232_v12 }
  0x42   : > { %262 = vmatpush.msra.mxu0 %v231_v13  ;;  %508 = vmatpush.msra.mxu1 %v231_v13 }
  0x44   : > { %263 = vmatpush.msra.mxu0 %v230_v14  ;;  %509 = vmatpush.msra.mxu1 %v230_v14 }
  0x46   : > { %264 = vmatpush.msra.mxu0 %v229_v15  ;;  %510 = vmatpush.msra.mxu1 %v229_v15 }
  0x47   : > { %265 = vmatmul.f32.vlgmr.msra.gmra.mxu0 %v227_v16  ;;  %268 = vmatmul.f32.vlgmr.msra.gmra.mxu1 %v228_v17 }
  0xc4   : > { %v266_v19 = vpop.f32.mrf.mxu0  ;;  %v269_v20 = vpop.f32.mrf.mxu1 }
  0xc5   : > { %v267_v21 = vadd.f32 %v586_v18, %v266_v19  ;;  %v270_v22 = vadd.f32 %v586_v18, %v269_v20 }
  0xc7   : > { %v272_v23 = vmax.f32 %v267_v21, 0.0  ;;  %v273_v24 = vmax.f32 %v270_v22, 0.0 }
  0xc9   : > { %v276_v25 = vrot.slane %v272_v23, 2  ;;  %v277_v26 = vrot.slane %v272_v23, 4  ;;  %v278_v27 = vrot.slane %v272_v23, 6  ;;  %v289_v28 = vsel %vm288_vm0, %v272_v23, -inf }
  0xca   : > { %v290_v29 = vrot.slane %v289_v28, 4  ;;  %v279_v30 = vrot.slane %v273_v24, 2  ;;  %v280_v31 = vrot.slane %v273_v24, 4  ;;  %v281_v32 = vrot.slane %v273_v24, 6 }
  0xcb   : > { %v296_v33 = vsel %vm288_vm0, %v276_v25, -inf  ;;  %v303_v34 = vsel %vm288_vm0, %v277_v26, -inf  ;;  %v310_v35 = vsel %vm288_vm0, %v278_v27, -inf  ;;  %v317_v36 = vsel %vm288_vm0, %v273_v24, -inf }
  0xcc   : > { %v291_v37 = vmax.f32 %v289_v28, %v290_v29  ;;  %v297_v38 = vrot.slane %v296_v33, 4  ;;  %v304_v39 = vrot.slane %v303_v34, 4  ;;  %v311_v40 = vrot.slane %v310_v35, 4 }
  0xcd   : > { %v318_v41 = vrot.slane %v317_v36, 4  ;;  %v324_v42 = vsel %vm288_vm0, %v279_v30, -inf  ;;  %v331_v43 = vsel %vm288_vm0, %v280_v31, -inf  ;;  %v338_v44 = vsel %vm288_vm0, %v281_v32, -inf }
  0xce   : > { %v292_v45 = vrot.slane %v291_v37, 2  ;;  %v298_v46 = vmax.f32 %v296_v33, %v297_v38  ;;  %v305_v47 = vmax.f32 %v303_v34, %v304_v39  ;;  %v312_v48 = vmax.f32 %v310_v35, %v311_v40 }
  0xcf   : > { %v319_v49 = vmax.f32 %v317_v36, %v318_v41  ;;  %v325_v50 = vrot.slane %v324_v42, 4  ;;  %v332_v51 = vrot.slane %v331_v43, 4  ;;  %v339_v52 = vrot.slane %v338_v44, 4 }
  0xd0   : > { %v293_v53 = vmax.f32 %v291_v37, %v292_v45  ;;  %v299_v54 = vrot.slane %v298_v46, 2  ;;  %v306_v55 = vrot.slane %v305_v47, 2  ;;  %v313_v56 = vrot.slane %v312_v48, 2 }
  0xd1   : > { %v320_v57 = vrot.slane %v319_v49, 2  ;;  %v326_v58 = vmax.f32 %v324_v42, %v325_v50  ;;  %v333_v59 = vmax.f32 %v331_v43, %v332_v51  ;;  %v340_v60 = vmax.f32 %v338_v44, %v339_v52 }
  0xd2   : > { %v294_v61 = vrot.slane %v293_v53, 1  ;;  %v300_v62 = vmax.f32 %v298_v46, %v299_v54  ;;  %v307_v63 = vmax.f32 %v305_v47, %v306_v55  ;;  %v314_v0 = vmax.f32 %v312_v48, %v313_v56 }
  0xd3   : > { %v321_v1 = vmax.f32 %v319_v49, %v320_v57  ;;  %v327_v2 = vrot.slane %v326_v58, 2  ;;  %v334_v3 = vrot.slane %v333_v59, 2  ;;  %v341_v4 = vrot.slane %v340_v60, 2 }
  0xd4   : > { %v301_v5 = vrot.slane %v300_v62, 1  ;;  %v308_v6 = vrot.slane %v307_v63, 1  ;;  %v315_v7 = vrot.slane %v314_v0, 1  ;;  %v295_v12 = vmax.f32 %v293_v53, %v294_v61 }
  0xd5   : > { %v322_v8 = vrot.slane %v321_v1, 1  ;;  %v328_v9 = vmax.f32 %v326_v58, %v327_v2  ;;  %v335_v10 = vmax.f32 %v333_v59, %v334_v3  ;;  %v342_v11 = vmax.f32 %v340_v60, %v341_v4 }
  0xd6   : > { %v302_v13 = vmax.f32 %v300_v62, %v301_v5  ;;  %v309_v14 = vmax.f32 %v307_v63, %v308_v6  ;;  %v316_v17 = vmax.f32 %v314_v0, %v315_v7 }
  0xd7   : > { %v329_v15 = vrot.slane %v328_v9, 1  ;;  %v336_v16 = vrot.slane %v335_v10, 1  ;;  %v343_v19 = vrot.slane %v342_v11, 1  ;;  %v323_v20 = vmax.f32 %v321_v1, %v322_v8 }
  0xd8   : > { %v354_v18 = vsel %vm353_vm1, %v302_v13, %v295_v12 }
  0xd9   : > { %v356_v21 = vsel %vm355_vm2, %v309_v14, %v354_v18  ;;  %v330_v22 = vmax.f32 %v328_v9, %v329_v15  ;;  %v337_v24 = vmax.f32 %v335_v10, %v336_v16  ;;  %v344_v26 = vmax.f32 %v342_v11, %v343_v19 }
  0xda   : > { %v358_v23 = vsel %vm357_vm3, %v316_v17, %v356_v21 }
  0xdb   : > { %v360_v25 = vsel %vm359_vm4, %v323_v20, %v358_v23 }
  0xdc   : > { %v362_v27 = vsel %vm361_vm5, %v330_v22, %v360_v25 }
  0xdd   : > { %v364_v28 = vsel %vm363_vm6, %v337_v24, %v362_v27 }
  0xde   : > { %v366_v29 = vsel %vm365_vm7, %v344_v26, %v364_v28 }
  0xdf   : > { %368 = vst [vmem:[%s225_s15] sm:$0xff] %v366_v29 }
  0xe0   : > { %674 = shalt.err (!%p671_p0)
}
  0xe1   : > { %517 = dma.vmem_to_hbm [thread:$0]  (%p840_p5), %s384_s10, 128, %s386_s24, %s370_s25  }
  0xe2 PF: > { %s397_s6 = sand.u32 1, %s713_s12   ;;  %p528_p3 = pnand %p482_p11, %p807_p6 }
  0xe3   : > { %s398_s1 = scalar_lea.sflag [#allocation4], %s397_s6 }
  0xe4   : > { %p529_p7 = pneg %p528_p3 }
  0xe6   : > { %708 = dma.done.wait (%p529_p7), %s398_s1, 128  }
  0xe7   : > { %710 = vsyncadd (%p529_p7), %s398_s1, 4294967168  ;;  %s20_s17 = sadd.s32 1, %s733_s17   ;;  %s945_s12 = smov %s717_s13 }
  0xe8   : > { %p17_p9 = scmp.ge.s32.totalorder %s20_s17, 4   ;;  %s946_s13 = smov %s721_s14 }
  0xe9   : > { %s947_s14 = smov %s849_s18  ;;  %s948_s15 = smov %s729_s16 }
  0xea   : > { %s949_s16 = smov %s951_s5  ;;  %19 = sbr.rel (!%p17_p9) target bundleno = 9 (0x9), region = 81 }
  0xef   :  { %404 = vsyncpa [#allocation3], 1 }
  0xf0   :  { %406 = vsyncpa [#allocation3 + $0x1], 1 }
  0xf1   :  { %407 = vsyncpa [#allocation6], 1 }
  0xf2   :  { %408 = vsyncpa [#allocation4], 1 }
  0xf3   :  { %410 = vsyncpa [#allocation4 + $0x1], 1 }

</bundles_post_ra>
